<compile_context>
chip_gen: v6e
topology: v6e:2x2x1
jax: 0.10.0
libtpu: 0.0.40
codegen_flags: <defaults>
</compile_context>

<pallas_src>
import jax
import jax.numpy as jnp
from jax.experimental import pallas as pl
from jax.experimental.pallas import tpu as pltpu


def _dense_bias_kernel(x_ref, w_ref, b_ref, o_ref):
    # x_ref: (tm, I) activation rows, w_ref: (I, tn) weight block,
    # b_ref: (1, tn) bias slice, o_ref: (tm, tn) output tile.
    y = jnp.dot(x_ref[...], w_ref[...], preferred_element_type=jnp.float32)
    y = y + b_ref[...].astype(jnp.float32)  # bias add in f32 epilogue
    # TODO(synk): training-mode dropout (pltpu.prng_random_bits + mask); this
    # kernel implements inference mode, where dropout is the identity.
    o_ref[...] = y.astype(o_ref.dtype)


def _dense_bias_residual_kernel(x_ref, w_ref, b_ref, r_ref, o_ref):
    # Same as above plus a fused residual add (optional; VivitLayer normally
    # applies the residual outside this module).
    y = jnp.dot(x_ref[...], w_ref[...], preferred_element_type=jnp.float32)
    y = y + b_ref[...].astype(jnp.float32)
    y = y + r_ref[...].astype(jnp.float32)
    o_ref[...] = y.astype(o_ref.dtype)


def _round_up(x, m):
    return ((x + m - 1) // m) * m


def _vmem_bytes(tm, tn, in_features, itemsize, with_residual):
    # Double-buffered blocks: activations, weight, bias, output (+ residual).
    blocks = tm * in_features + in_features * tn + tn + tm * tn
    if with_residual:
        blocks += tm * tn
    return 2 * blocks * itemsize


def _select_tiles(M, in_features, H, itemsize, budget, with_residual):
    """Pick (tm, tn): prefer a resident weight (tn == H) with the largest
    MXU-aligned row tile that fits the VMEM budget; tile H only as a last
    resort (very large hidden sizes on small-VMEM parts)."""
    M8 = _round_up(max(M, 1), 8)
    for cand in (1024, 512, 256, 128, 64, 32, 16, 8):
        tm = min(cand, M8)
        if _vmem_bytes(tm, H, in_features, itemsize, with_residual) <= budget:
            return tm, H
    # Even the smallest row tile does not fit with a resident weight:
    # tile the output-feature axis with the largest fitting 128-multiple
    # divisor of H.
    tm = min(128, M8)
    if H % 128 == 0:
        tn = 128
        for tn_cand in range(H, 127, -128):
            if H % tn_cand == 0 and _vmem_bytes(
                    tm, tn_cand, in_features, itemsize, with_residual) <= budget:
                tn = tn_cand
                break
        return tm, tn
    return tm, H  # rare: hidden size not a multiple of 128; keep full width


def vivit_self_output(hidden_states, weight, bias, input_tensor=None, *,
                      add_residual=False, compute_dtype=None,
                      vmem_budget_bytes=36 * 1024 * 1024):
    """hidden_states: [B, S, I]; weight: [I, H] (transposed vs nn.Linear); bias: [H].

    `input_tensor` mirrors the PyTorch signature; it is unused unless
    `add_residual=True` (the residual normally lives in VivitLayer).
    `compute_dtype=jnp.bfloat16` casts activations/weight for the MXU while
    keeping f32 accumulation and the original output dtype.
    """
    B, S, in_features = hidden_states.shape
    H = weight.shape[1]
    M = B * S
    out_dtype = hidden_states.dtype

    x2d = hidden_states.reshape(M, in_features)
    w = weight
    if compute_dtype is not None:
        x2d = x2d.astype(compute_dtype)
        w = w.astype(compute_dtype)
    b2d = bias.reshape(1, H)

    itemsize = jnp.dtype(x2d.dtype).itemsize
    tm, tn = _select_tiles(M, in_features, H, itemsize,
                           vmem_budget_bytes, add_residual)

    grid_m = pl.cdiv(M, tm)
    # v7x megacore: ensure >= 2 blocks on a "parallel" axis when M allows it,
    # so both TensorCores get work even for small-batch / short-seq inference.
    if grid_m == 1 and tn == H and _round_up(M, 8) > 8:
        tm = _round_up(-(-M // 2), 8)
        grid_m = pl.cdiv(M, tm)
    grid_n = H // tn
    grid = (grid_m, grid_n)

    # HBM-traffic estimate: the weight is re-fetched per row tile only when H
    # is column-tiled; with tn == H it is DMA'd once and stays resident.
    w_fetches = 1 if tn == H else grid_m
    cost = pl.CostEstimate(
        flops=2 * M * in_features * H,
        transcendentals=0,
        bytes_accessed=int(
            (M * in_features + w_fetches * in_features * H + H) * itemsize
            + M * H * jnp.dtype(out_dtype).itemsize
            + (M * H * itemsize if add_residual else 0)),
    )

    in_specs = [
        pl.BlockSpec((tm, in_features), lambda i, j: (i, 0)),   # activation rows
        pl.BlockSpec((in_features, tn), lambda i, j: (0, j)),   # weight (resident if tn == H)
        pl.BlockSpec((1, tn), lambda i, j: (0, j)),             # bias slice
    ]
    args = [x2d, w, b2d]
    kernel = _dense_bias_kernel
    if add_residual:
        res2d = input_tensor.reshape(M, H)
        in_specs.append(pl.BlockSpec((tm, tn), lambda i, j: (i, j)))
        args.append(res2d)
        kernel = _dense_bias_residual_kernel

    out2d = pl.pallas_call(
        kernel,
        out_shape=jax.ShapeDtypeStruct((M, H), out_dtype),
        grid_spec=pltpu.PrefetchScalarGridSpec(
            num_scalar_prefetch=0,
            grid=grid,
            in_specs=in_specs,
            out_specs=pl.BlockSpec((tm, tn), lambda i, j: (i, j)),
        ),
        compiler_params=pltpu.CompilerParams(
            dimension_semantics=("parallel", "parallel"),
            # Above v5e's 16 MiB scoped default, under v7x's 64 MiB physical.
            vmem_limit_bytes=48 * 1024 * 1024,
        ),
        cost_estimate=cost,
    )(*args)

    return out2d.reshape(B, S, H)


if __name__ == "__main__":
    # Small config: hidden_size=128 (lane-dense output), batch=2, seq=16.
    B, S, Hd = 2, 16, 128
    key = jax.random.PRNGKey(0)
    k1, k2, k3, k4 = jax.random.split(key, 4)

    hidden_states = jax.random.normal(k1, (B, S, Hd), dtype=jnp.float32)
    input_tensor = jax.random.normal(k2, (B, S, Hd), dtype=jnp.float32)
    # nn.Linear(Hd, Hd) weight is [out, in]; we store it transposed as [in, out].
    weight = jax.random.normal(k3, (Hd, Hd), dtype=jnp.float32) * 0.02
    bias = jax.random.normal(k4, (Hd,), dtype=jnp.float32) * 0.02

    # Module-parity path (no residual, dropout = identity).
    out = vivit_self_output(hidden_states, weight, bias, input_tensor)
    out = jax.block_until_ready(out)
    ref = (hidden_states.reshape(B * S, Hd) @ weight + bias).reshape(B, S, Hd)
    assert out.shape == (B, S, Hd)
    assert jnp.allclose(out, ref, atol=1e-5, rtol=1e-5), "mismatch vs reference"

    # Optional fused-residual epilogue (off by default; checked here for sanity).
    out_res = vivit_self_output(hidden_states, weight, bias, input_tensor,
                                add_residual=True)
    out_res = jax.block_until_ready(out_res)
    assert jnp.allclose(out_res, ref + input_tensor, atol=1e-5, rtol=1e-5), \
        "mismatch vs residual reference"

    # Ragged row count (M not a multiple of the row tile): exercises the
    # masked tail block (no jnp.pad materialization in the wrapper).
    Sr = 13
    hs_r = jax.random.normal(k1, (1, Sr, Hd), dtype=jnp.float32)
    out_r = jax.block_until_ready(vivit_self_output(hs_r, weight, bias))
    ref_r = (hs_r.reshape(Sr, Hd) @ weight + bias).reshape(1, Sr, Hd)
    assert jnp.allclose(out_r, ref_r, atol=1e-5, rtol=1e-5), "mismatch (ragged M)"

    print("KERNEL_OK")
</pallas_src>

<mosaic_0001>
module attributes {stable_mosaic.version = 11 : i64} {
  func.func @_dense_bias_kernel(%arg0: i32, %arg1: i32, %arg2: memref<16x128xf32, #tpu.memory_space<vmem>>, %arg3: memref<128x128xf32, #tpu.memory_space<vmem>>, %arg4: memref<1x128xf32, #tpu.memory_space<vmem>>, %arg5: memref<16x128xf32, #tpu.memory_space<vmem>>) attributes {dimension_semantics = [#tpu.dimension_semantics<parallel>, #tpu.dimension_semantics<parallel>], iteration_bounds = array<i64: 2, 1>, scalar_prefetch = 0 : i64, scratch_operands = 0 : i64, tpu.core_type = #tpu.core_type<tc>, window_params = [{transform_indices = @transform_0, window_bounds = array<i64: 16, 128>}, {transform_indices = @transform_1, window_bounds = array<i64: 128, 128>}, {transform_indices = @transform_2, window_bounds = array<i64: 1, 128>}, {transform_indices = @transform_3, window_bounds = array<i64: 16, 128>}]} {
    %c0 = arith.constant 0 : index
    %c0_0 = arith.constant 0 : index
    %0 = vector.load %arg2[%c0, %c0_0] : memref<16x128xf32, #tpu.memory_space<vmem>>, vector<16x128xf32>
    %c0_1 = arith.constant 0 : index
    %c0_2 = arith.constant 0 : index
    %1 = vector.load %arg3[%c0_1, %c0_2] : memref<128x128xf32, #tpu.memory_space<vmem>>, vector<128x128xf32>
    %cst = arith.constant dense<0.000000e+00> : vector<16x128xf32>
    %2 = tpu.matmul %0, %1, %cst {dimension_numbers = #tpu.dot_dimension_numbers<[1], [0], [0], [1], [0, 0, 1, 1], [], []>} : vector<16x128xf32>, vector<128x128xf32>, vector<16x128xf32> -> vector<16x128xf32>
    %c0_3 = arith.constant 0 : index
    %c0_4 = arith.constant 0 : index
    %3 = vector.load %arg4[%c0_3, %c0_4] : memref<1x128xf32, #tpu.memory_space<vmem>>, vector<1x128xf32>
    %4 = vector.broadcast %3 : vector<1x128xf32> to vector<16x128xf32>
    %5 = arith.addf %2, %4 : vector<16x128xf32>
    %c0_5 = arith.constant 0 : index
    %c0_6 = arith.constant 0 : index
    %6 = vector.load %arg5[%c0_5, %c0_6] : memref<16x128xf32, #tpu.memory_space<vmem>>, vector<16x128xf32>
    tpu.vector_store %arg5[%c0_5, %c0_6], %5 {strides = array<i32>} : memref<16x128xf32, #tpu.memory_space<vmem>>, vector<16x128xf32>,
    return
  }
  func.func @transform_0(%arg0: i32, %arg1: i32) -> (i32, i32) {
    %c0_i32 = arith.constant 0 : i32
    %c0_i32_0 = arith.constant 0 : i32
    return %arg0, %c0_i32 : i32, i32
  }
  func.func @transform_1(%arg0: i32, %arg1: i32) -> (i32, i32) {
    %c0_i32 = arith.constant 0 : i32
    %c0_i32_0 = arith.constant 0 : i32
    return %c0_i32, %arg1 : i32, i32
  }
  func.func @transform_2(%arg0: i32, %arg1: i32) -> (i32, i32) {
    %c0_i32 = arith.constant 0 : i32
    %c0_i32_0 = arith.constant 0 : i32
    return %c0_i32, %arg1 : i32, i32
  }
  func.func @transform_3(%arg0: i32, %arg1: i32) -> (i32, i32) {
    %c0_i32 = arith.constant 0 : i32
    return %arg0, %arg1 : i32, i32
  }
}

</mosaic_0001>

<bundles_post_ra>
// kernel: tpu_custom_call.1
= control target key start
LH: loop header
LB: loop body
LE: loop exit
PB: predicated region body
PF: predicated region fallthrough
CT: control target
= control target key end

     0   :  { %8 = vsyncpa [#allocation3], 0  ;;  %s981_s0 = inlined_call_operand.hbm [shape: f32[32,128], index: 0, kind: input, shape index: {}]   ;;  %s982_s1 = inlined_call_operand.hbm [shape: f32[128,128], index: 1, kind: input, shape index: {}]   ;;  %s983_s2 = inlined_call_operand.vmem [shape: f32[1,128], index: 2, kind: input, shape index: {}]   ;;  %s984_s3 = inlined_call_operand.hbm [shape: f32[32,128], index: 3, kind: output, shape index: {}]  }
   0x1   :  { %10 = vsyncpa [#allocation3 + $0x1], 0 }
   0x2   :  { %11 = vsyncpa [#allocation6], 0 }
   0x3   :  { %12 = vsyncpa [#allocation4], 0 }
   0x4   :  { %14 = vsyncpa [#allocation4 + $0x1], 0  ;;  %s783_s12 = smov 0   ;;  %s785_s13 = smov 0  }
   0x5   :  { %s787_s14 = smov 0   ;;  %s789_s15 = smov 0  }
   0x6   :  { %s791_s16 = smov 0   ;;  %s793_s17 = smov 0  }
   0x7 LB: > { %s465_s18 = sadd.s32 4294967295, %s754_s17   ;;  %s466_s19 = sadd.s32 4294967294, %s754_s17   ;;  %s754_s17 = sphi %s793_s17, %s20_s17   ;;  %s750_s16 = sphi %s791_s16, %s1006_s16   ;;  %s746_s15 = sphi %s789_s15, %s1005_s15   ;;  %s742_s14 = sphi %s787_s14, %s1004_s14   ;;  %s738_s13 = sphi %s785_s13, %s1003_s13   ;;  %s734_s12 = sphi %s783_s12, %s1002_s12  }
   0x8   : > { %p52_p0 = scmp.ne.s32.totalorder %s738_s13, %s734_s12  ;;  %p817_p1 = scmp.eq.s32.totalorder %s465_s18, 0 }
   0x9   : > { %p821_p2 = scmp.eq.s32.totalorder %s465_s18, 1  ;;  %p136_p3 = scmp.eq.s32.totalorder %s466_s19, 1 }
   0xa   : > { %p827_p4 = por %p817_p1, %p52_p0  ;;  %p467_p5 = scmp.ge.s32.totalorder %s754_s17, 1 }
   0xb   : > { %p832_p6 = por %p136_p3, %p52_p0  ;;  %p143_p7 = scmp.lt.s32.totalorder %s754_s17, 3 }
   0xc   : > { %s990_s22 = scalar_select %p827_p4, 1, 0 }
   0xd   : > { %s991_s23 = scalar_select %p832_p6, 1, 0 }
   0xe   : > { %p837_p8 = pnand %p467_p5, %p143_p7  ;;  %s756_s25 = smov [#allocation5]  }
   0xf   : > { %s157_s26 = sshll.u32 %s756_s25, 4  ;;  %s32_s28 = sadd.s32 1, %s750_s16  ;;  %s158_s26 = int_to_ptr.vmem [resolvable:$true] %s157_s26 }
  0x10   : > { %p547_p9 = pneg %p837_p8  ;;  %s627_s29 = scalar_lea.vmem %s158_s26, 2048 }
  0x11   : > { %p628_p13 = scmp.ne.s32.totalorder %s158_s26, %s627_s29  ;;  %p635_p5 = scmp.lt.s32.totalorder %s158_s26, %s158_s26 }
  0x12   : > { %p846_p11 = pnand %p547_p9, %p817_p1  ;;  %p636_p7 = scmp.lt.s32.totalorder %s627_s29, %s627_s29 }
  0x14   : > { %p618_p12 = pneg %p846_p11  ;;  %p637_p6 = por %p636_p7, %p635_p5 }
  0x16   : > { %p630_p0 = pnand %p628_p13, %p618_p12 }
  0x18   : > { %p631_p3 = pneg %p630_p0 }
  0x1a   : > { %p638_p4 = pnand %p637_p6, %p631_p3 }
  0x1c   : > { %641 = shalt.err (!%p638_p4)
}
  0x1d   : > { %s986_s30 = smov 128   ;;  %s987_s4 = smov 8  }
  0x1e   : > { %550 = dma.hbm_to_vmem [thread:$0]  (!%p846_p11), %s982_s1, 2048, %s158_s26, [#allocation6], %s986_s30, %s986_s30, %s987_s4  }
  0x1f   : > { %p34_p4 = scmp.ge.s32.totalorder %s32_s28, 2  ;;  %s39_s7 = sadd.s32 1, %s742_s14 }
  0x20   : > { %p46_p6 = scmp.ne.s32.totalorder %s742_s14, %s738_s13  ;;  %p47_p9 = scmp.eq.s32.totalorder %s754_s17, 0 }
  0x21   : > { %s1008_s28 = smov (%p34_p4, %s32_s28), 0  ;;  %p560_p0 = scmp.lt.s32.totalorder %s754_s17, 2 }
  0x22   : > { %p867_p12 = por %p47_p9, %p46_p6  ;;  %p873_p13 = por %p821_p2, %p46_p6 }
  0x23   : > { %s36_s10 = ssub.s32 %s750_s16, %s1008_s28  ;;  %s177_s11 = sand.u32 1, %s742_s14  }
  0x24   : > { %p37_p11 = scmp.eq.s32.totalorder %s36_s10, 0  ;;  %s471_s18 = sshll.u32 %s177_s11, 4 }
  0x25   : > { %s484_s25 = sshll.u32 %s750_s16, 8  ;;  %s181_s5 = scalar_lea.vmem [#allocation2], %s471_s18 }
  0x26   : > { %s882_s19 = scalar_select %p37_p11, %s742_s14, %s39_s7  }
  0x27   : > { %s187_s29 = scalar_lea.hbm %s981_s0, %s484_s25  ;;  %s188_s6 = sshll.u32 %s181_s5, 4  ;;  %s189_s6 = int_to_ptr.vmem [resolvable:$true] %s188_s6 }
  0x28   : > { %p890_p2 = pnand %p560_p0, %p867_p12  ;;  %s178_s30 = scalar_lea.sflag [#allocation3], %s177_s11 }
  0x29   : > { %s655_s10 = scalar_lea.vmem %s189_s6, 256  ;;  %s759_s7 = smov [#allocation2]  }
  0x2a   : > { %p644_p3 = pneg %p890_p2  ;;  %p656_p5 = scmp.ne.s32.totalorder %s189_s6, %s655_s10 }
  0x2b   : > { %s660_s4 = sshll.u32 %s759_s7, 4  ;;  %s661_s4 = int_to_ptr.vmem [resolvable:$false] %s660_s4 }
  0x2c   : > { %p658_p7 = pnand %p656_p5, %p644_p3  ;;  %s662_s25 = scalar_lea.vmem %s661_s4, 512 }
  0x2d   : > { %p663_p6 = scmp.lt.s32.totalorder %s189_s6, %s661_s4  ;;  %p664_p9 = scmp.lt.s32.totalorder %s662_s25, %s655_s10 }
  0x2e   : > { %p659_p4 = pneg %p658_p7 }
  0x2f   : > { %p665_p11 = por %p664_p9, %p663_p6 }
  0x31   : > { %p666_p10 = pnand %p665_p11, %p659_p4 }
  0x33   : > { %669 = shalt.err (!%p666_p10)
}
  0x34   : > { %s997_s8 = smov 8   ;;  %s998_s18 = smov 128  }
  0x35   : > { %554 = dma.hbm_to_vmem [thread:$0]  (!%p890_p2), %s187_s29, 256, %s189_s6, %s178_s30, %s998_s18, %s998_s18, %s997_s8  }
  0x36   : > { %200 = sbr.rel (%p837_p8) target bundleno = 306 (0x132), region = 32  ;;  %s904_s11 = sand.u32 (!%p837_p8), 1, %s738_s13  }
  0x37   : > { %s475_s4 = sshll.u32 (!%p837_p8), %s904_s11, 4  ;;  %s203_s26 = scalar_lea.sflag (!%p837_p8), [#allocation3], %s904_s11 }
  0x38   : > { %s910_s27 = scalar_lea.vmem (!%p837_p8), [#allocation2], %s475_s4  ;;  %p999_p10 = scmp.ne.s32.totalorder (!%p837_p8), %s990_s22, 0 }
  0x3b   : > { %721 = dma.done.wait (%p999_p10), %s203_s26, 256  }
  0x3c   : > { %723 = vsyncadd (%p999_p10), %s203_s26, 4294967040 }
  0x3d   : > { %725 = dma.done.wait (%p817_p1), [#allocation6], 2048  }
  0x3e   : > { %727 = vsyncadd (%p817_p1), [#allocation6], 4294965248  ;;  %v258_v0 = vld [vmem:[#allocation5 + $0x78] sm:$0xff]  ;;  %v257_v1 = vld [vmem:[#allocation5 + $0x70] sm:$0xff]  ;;  %s235_s24 = scalar_lea.vmem [#allocation7], %s475_s4  ;;  %s485_s29 = sshll.u32 %s746_s15, 8 }
  0x3f   : > { %504 = vmatprep.subr.mxu0 %v258_v0  ;;  %v256_v2 = vld [vmem:[#allocation5 + $0x68] sm:$0xff]  ;;  %v255_v3 = vld [vmem:[#allocation5 + $0x60] sm:$0xff]  ;;  %v254_v5 = vld [vmem:[#allocation5 + $0x58] sm:$0xff]  ;;  %s358_s30 = sshll.u32 %s235_s24, 4  ;;  %s933_s21 = scalar_lea.hbm %s984_s3, %s485_s29  ;;  %s928_s30 = int_to_ptr.vmem [resolvable:$true] %s358_s30 }
  0x40   : > { %505 = vmatpush3.msra.mxu0 %v258_v0  ;;  %v241_v4 = vld [vmem:[%s910_s27] sm:$0xff]  ;;  %v252_v7 = vld [vmem:[#allocation5 + $0x48] sm:$0xff]  ;;  %v250_v9 = vld [vmem:[#allocation5 + $0x38] sm:$0xff]  ;;  %s344_s10 = scalar_lea.sflag [#allocation4], %s904_s11  ;;  %s670_s7 = scalar_lea.vmem %s928_s30, 256 }
  0x41   : > { %506 = vmatprep.subr.mxu0 %v257_v1  ;;  %536 = vmatprep.mubr.f32.mxu0 %v241_v4  ;;  %v253_v6 = vld [vmem:[#allocation5 + $0x50] sm:$0xff]  ;;  %v251_v8 = vld [vmem:[#allocation5 + $0x40] sm:$0xff]  ;;  %v248_v11 = vld [vmem:[#allocation5 + $0x28] sm:$0xff]  ;;  %p671_p1 = scmp.ne.s32.totalorder %s928_s30, %s670_s7  ;;  %s760_s15 = smov [#allocation7]  }
  0x42   : > { %507 = vmatpush3.msra.mxu0 %v257_v1  ;;  %v249_v10 = vld [vmem:[#allocation5 + $0x30] sm:$0xff]  ;;  %v247_v12 = vld [vmem:[#allocation5 + $0x20] sm:$0xff]  ;;  %v246_v13 = vld [vmem:[#allocation5 + $0x18] sm:$0xff]  ;;  %s674_s25 = sshll.u32 %s760_s15, 4  ;;  %s675_s25 = int_to_ptr.vmem [resolvable:$false] %s674_s25 }
  0x43   : > { %508 = vmatprep.subr.mxu0 %v256_v2  ;;  %v245_v14 = vld [vmem:[#allocation5 + $0x10] sm:$0xff]  ;;  %v244_v15 = vld [vmem:[#allocation5 + $0x8] sm:$0xff]  ;;  %v243_v16 = vld [vmem:[#allocation5] sm:$0xff]  ;;  %p672_p8 = pnand %p671_p1, %p873_p13  ;;  %s676_s8 = scalar_lea.vmem %s675_s25, 512 }
  0x44   : > { %509 = vmatpush3.msra.mxu0 %v256_v2  ;;  %v242_v17 = vld [vmem:[%s910_s27 + $0x8] sm:$0xff]  ;;  %v478_v18 = vld [vmem:[%s983_s2] ss:$0 sm:$0xff]  ;;  %p677_p0 = scmp.lt.s32.totalorder %s928_s30, %s675_s25  ;;  %p678_p2 = scmp.lt.s32.totalorder %s676_s8, %s670_s7 }
  0x45   : > { %510 = vmatprep.subr.mxu0 %v255_v3  ;;  %p673_p12 = pneg %p672_p8 }
  0x46   : > { %511 = vmatpush3.msra.mxu0 %v255_v3  ;;  %p679_p3 = por %p678_p2, %p677_p0 }
  0x47   : > { %512 = vmatprep.subr.mxu0 %v254_v5 }
  0x48   : > { %513 = vmatpush3.msra.mxu0 %v254_v5  ;;  %p680_p5 = pnand %p679_p3, %p673_p12 }
  0x49   : > { %514 = vmatprep.subr.mxu0 %v253_v6 }
  0x4a   : > { %515 = vmatpush3.msra.mxu0 %v253_v6 }
  0x4b   : > { %516 = vmatprep.subr.mxu0 %v252_v7 }
  0x4c   : > { %517 = vmatpush3.msra.mxu0 %v252_v7 }
  0x4d   : > { %518 = vmatprep.subr.mxu0 %v251_v8 }
  0x4e   : > { %519 = vmatpush3.msra.mxu0 %v251_v8 }
  0x4f   : > { %520 = vmatprep.subr.mxu0 %v250_v9 }
  0x50   : > { %521 = vmatpush3.msra.mxu0 %v250_v9 }
  0x51   : > { %522 = vmatprep.subr.mxu0 %v249_v10 }
  0x52   : > { %523 = vmatpush3.msra.mxu0 %v249_v10 }
  0x53   : > { %524 = vmatprep.subr.mxu0 %v248_v11 }
  0x54   : > { %525 = vmatpush3.msra.mxu0 %v248_v11 }
  0x55   : > { %526 = vmatprep.subr.mxu0 %v247_v12 }
  0x56   : > { %527 = vmatpush3.msra.mxu0 %v247_v12 }
  0x57   : > { %528 = vmatprep.subr.mxu0 %v246_v13 }
  0x58   : > { %529 = vmatpush3.msra.mxu0 %v246_v13 }
  0x59   : > { %530 = vmatprep.subr.mxu0 %v245_v14 }
  0x5a   : > { %531 = vmatpush3.msra.mxu0 %v245_v14 }
  0x5b   : > { %532 = vmatprep.subr.mxu0 %v244_v15 }
  0x5c   : > { %533 = vmatpush3.msra.mxu0 %v244_v15 }
  0x5d   : > { %534 = vmatprep.subr.mxu0 %v243_v16 }
  0x5e   : > { %535 = vmatpush3.msra.mxu0 %v243_v16 }
  0x5f   : > { %537 = vmatmul.mubr.f32.vlgmr.msra.gmra.mxu0 %v242_v17 }
 0x11f   : > { %v538_v19 = vpop.f32.mrf.mxu0 }
 0x120   : > { %v338_v20 = vadd.f32 %v538_v19, %v478_v18 }
 0x121   : > { %v332_v21 = vpop.f32.mrf.mxu0 }
 0x122   : > { %342 = vst [vmem:[%s235_s24 + $0x8] sm:$0xff] %v338_v20  ;;  %v333_v22 = vadd.f32 %v478_v18, %v332_v21 }
 0x124   : > { %341 = vst [vmem:[%s235_s24] sm:$0xff] %v333_v22 }
 0x125   : > { %683 = shalt.err (!%p680_p5)
}
 0x126   : > { %s684_s18 = scalar_lea.hbm %s933_s21, 256  ;;  %s688_s27 = scalar_lea.hbm %s984_s3, 512 }
 0x127   : > { %p685_p7 = scmp.ne.s32.totalorder %s933_s21, %s684_s18  ;;  %p689_p9 = scmp.lt.s32.totalorder %s933_s21, %s984_s3 }
 0x128   : > { %p690_p11 = scmp.lt.s32.totalorder %s688_s27, %s684_s18 }
 0x129   : > { %p686_p4 = pnand %p685_p7, %p873_p13 }
 0x12a   : > { %p691_p10 = por %p690_p11, %p689_p9 }
 0x12b   : > { %p687_p6 = pneg %p686_p4 }
 0x12d   : > { %p692_p1 = pnand %p691_p10, %p687_p6 }
 0x12f   : > { %695 = shalt.err (!%p692_p1)
}
 0x130   : > { %s761_s24 = smov 128   ;;  %s762_s29 = smov 8  }
 0x131   : > { %545 = dma.vmem_to_hbm [thread:$0]  (%p873_p13), %s928_s30, 256, %s933_s21, %s344_s10, %s761_s24, %s761_s24, %s762_s29  }
 0x132 PF: > { %s373_s5 = sand.u32 1, %s734_s12   ;;  %p1000_p8 = scmp.ne.s32.totalorder %s991_s23, 0 }
 0x133   : > { %p1001_p12 = scmp.ge.s32.totalorder %s754_s17, 2  ;;  %s374_s6 = scalar_lea.sflag [#allocation4], %s373_s5 }
 0x135   : > { %p556_p0 = pnand %p1001_p12, %p1000_p8 }
 0x137   : > { %p557_p2 = pneg %p556_p0 }
 0x139   : > { %729 = dma.done.wait (%p557_p2), %s374_s6, 256  }
 0x13a   : > { %731 = vsyncadd (%p557_p2), %s374_s6, 4294967040  ;;  %s20_s17 = sadd.s32 1, %s754_s17   ;;  %s1002_s12 = smov %s738_s13 }
 0x13b   : > { %p17_p3 = scmp.ge.s32.totalorder %s20_s17, 4   ;;  %s1003_s13 = smov %s742_s14 }
 0x13c   : > { %s1004_s14 = smov %s882_s19  ;;  %s1005_s15 = smov %s750_s16 }
 0x13d   : > { %s1006_s16 = smov %s1008_s28  ;;  %19 = sbr.rel (!%p17_p3) target bundleno = 7 (0x7), region = 85 }
 0x142   :  { %379 = vsyncpa [#allocation3], 1 }
 0x143   :  { %381 = vsyncpa [#allocation3 + $0x1], 1 }
 0x144   :  { %382 = vsyncpa [#allocation6], 1 }
 0x145   :  { %383 = vsyncpa [#allocation4], 1 }
 0x146   :  { %385 = vsyncpa [#allocation4 + $0x1], 1 }

</bundles_post_ra>
